<compile_context>
chip_gen: v5e
topology: v5e:2x2
jax: 0.10.0
libtpu: 0.0.40
codegen_flags: <defaults>
</compile_context>

<pallas_src>
import functools

import jax
import jax.numpy as jnp
from jax.experimental import pallas as pl
from jax.experimental.pallas import tpu as pltpu

LN_EPS = 1e-5  # torch.nn.LayerNorm default eps


def _layernorm_onepass(x, gamma, beta):
    """One-pass LayerNorm: both reductions are independent (overlap on XLU)."""
    n = x.shape[-1]
    inv_n = 1.0 / n
    s1 = jnp.sum(x, axis=-1, keepdims=True)
    s2 = jnp.sum(x * x, axis=-1, keepdims=True)
    mu = s1 * inv_n
    var = s2 * inv_n - mu * mu
    return (x - mu) * jax.lax.rsqrt(var + LN_EPS) * gamma + beta


def actor_kernel(state_ref, w1_ref, w2_ref, wmu_ref, vec_ref, out_ref,
                 *, fc1_dims, fc2_dims, n_actions):
    x = state_ref[...]

    # Packed vector slab: rows 0..6 = b1, g1, be1, b2, g2, be2, b_mu
    vecs = vec_ref[...]
    b1 = vecs[0:1, :fc1_dims]
    g1 = vecs[1:2, :fc1_dims]
    be1 = vecs[2:3, :fc1_dims]
    b2 = vecs[3:4, :fc2_dims]
    g2 = vecs[4:5, :fc2_dims]
    be2 = vecs[5:6, :fc2_dims]
    bmu = vecs[6:7, :n_actions]

    # x = relu(LayerNorm(fc1(state)))
    h = jnp.dot(x, w1_ref[...], preferred_element_type=jnp.float32) + b1
    h = _layernorm_onepass(h, g1, be1)
    h = jnp.maximum(h, 0.0)

    # x = relu(LayerNorm(fc2(x)))
    h = jnp.dot(h, w2_ref[...], preferred_element_type=jnp.float32) + b2
    h = _layernorm_onepass(h, g2, be2)
    h = jnp.maximum(h, 0.0)

    # x = tanh(mu(x))
    m = jnp.dot(h, wmu_ref[...], preferred_element_type=jnp.float32) + bmu
    out_ref[...] = jnp.tanh(m).astype(out_ref.dtype)


def _round_up(x, m):
    return ((x + m - 1) // m) * m


def pack_vectors(p, fc1_dims, fc2_dims, n_actions):
    """Pack all [F] vectors into one [8, max_width] f32 slab (1 operand, 1 DMA)."""
    vw = max(fc1_dims, fc2_dims, n_actions)
    slab = jnp.zeros((8, vw), jnp.float32)
    slab = slab.at[0, :fc1_dims].set(p["b1"])
    slab = slab.at[1, :fc1_dims].set(p["g1"])
    slab = slab.at[2, :fc1_dims].set(p["be1"])
    slab = slab.at[3, :fc2_dims].set(p["b2"])
    slab = slab.at[4, :fc2_dims].set(p["g2"])
    slab = slab.at[5, :fc2_dims].set(p["be2"])
    slab = slab.at[6, :n_actions].set(p["bmu"])
    return slab


def actor_forward(state, params):
    """Full actor forward pass in one pallas_call, tiled over the batch.

    state: [B, input_dims] float32
    returns [B, n_actions] float32
    """
    batch, input_dims = state.shape
    fc1_dims = params["w1"].shape[1]
    fc2_dims = params["w2"].shape[1]
    n_actions = params["wmu"].shape[1]

    # Batch tile: multiple of 8 sublanes, capped at 128; pad batch up to it.
    tb = min(_round_up(batch, 8), 128)
    padded = _round_up(batch, tb)
    if padded != batch:
        state = jnp.pad(state, ((0, padded - batch), (0, 0)))
    nb = padded // tb

    vec_slab = pack_vectors(params, fc1_dims, fc2_dims, n_actions)
    vw = vec_slab.shape[1]

    kernel = functools.partial(
        actor_kernel, fc1_dims=fc1_dims, fc2_dims=fc2_dims, n_actions=n_actions)

    flops = 2 * padded * (input_dims * fc1_dims + fc1_dims * fc2_dims
                          + fc2_dims * n_actions)
    bytes_accessed = 4 * (padded * input_dims + padded * n_actions
                          + input_dims * fc1_dims + fc1_dims * fc2_dims
                          + fc2_dims * n_actions + 8 * vw)
    transcendentals = padded * (2 + n_actions)  # 2 rsqrt + n_actions tanh / row

    out = pl.pallas_call(
        kernel,
        out_shape=jax.ShapeDtypeStruct((padded, n_actions), jnp.float32),
        grid=(nb,),
        in_specs=[
            pl.BlockSpec((tb, input_dims), lambda i: (i, 0)),       # state (streams)
            pl.BlockSpec((input_dims, fc1_dims), lambda i: (0, 0)),  # w1 (resident)
            pl.BlockSpec((fc1_dims, fc2_dims), lambda i: (0, 0)),    # w2 (resident)
            pl.BlockSpec((fc2_dims, n_actions), lambda i: (0, 0)),   # w_mu (resident)
            pl.BlockSpec((8, vw), lambda i: (0, 0)),                 # vector slab
        ],
        out_specs=pl.BlockSpec((tb, n_actions), lambda i: (i, 0)),
        compiler_params=pltpu.CompilerParams(
            dimension_semantics=("parallel",)),
        cost_estimate=pl.CostEstimate(
            flops=flops, transcendentals=transcendentals,
            bytes_accessed=bytes_accessed),
    )(state, params["w1"], params["w2"], params["wmu"], vec_slab)

    return out[:batch]


def init_params(key, input_dims, fc1_dims, fc2_dims, n_actions):
    """Deterministic init mirroring the PyTorch module's init scheme.

    Weights stored pre-transposed as [in_features, out_features].
    """
    ks = jax.random.split(key, 6)
    f1 = 1.0 / jnp.sqrt(jnp.float32(fc1_dims))   # fc1.weight.size(0) == fc1_dims
    f2 = 1.0 / jnp.sqrt(jnp.float32(fc2_dims))   # fc2.weight.size(0) == fc2_dims
    f3 = 0.003

    def unif(k, shape, lim):
        return jax.random.uniform(k, shape, jnp.float32, -lim, lim)

    return {
        "w1": unif(ks[0], (input_dims, fc1_dims), f1),
        "b1": unif(ks[1], (fc1_dims,), f1),
        "g1": jnp.ones((fc1_dims,), jnp.float32),    # bn1 (LayerNorm) weight
        "be1": jnp.zeros((fc1_dims,), jnp.float32),  # bn1 (LayerNorm) bias
        "w2": unif(ks[2], (fc1_dims, fc2_dims), f2),
        "b2": unif(ks[3], (fc2_dims,), f2),
        "g2": jnp.ones((fc2_dims,), jnp.float32),
        "be2": jnp.zeros((fc2_dims,), jnp.float32),
        "wmu": unif(ks[4], (fc2_dims, n_actions), f3),
        "bmu": unif(ks[5], (n_actions,), f3),
    }


def reference_forward(state, p):
    """Pure-JAX reference (same math as the PyTorch ActorNetwork.forward)."""
    x = state @ p["w1"] + p["b1"][None, :]
    mu = x.mean(-1, keepdims=True)
    var = ((x - mu) ** 2).mean(-1, keepdims=True)
    x = (x - mu) / jnp.sqrt(var + LN_EPS) * p["g1"][None, :] + p["be1"][None, :]
    x = jnp.maximum(x, 0.0)
    x = x @ p["w2"] + p["b2"][None, :]
    mu = x.mean(-1, keepdims=True)
    var = ((x - mu) ** 2).mean(-1, keepdims=True)
    x = (x - mu) / jnp.sqrt(var + LN_EPS) * p["g2"][None, :] + p["be2"][None, :]
    x = jnp.maximum(x, 0.0)
    return jnp.tanh(x @ p["wmu"] + p["bmu"][None, :])


if __name__ == "__main__":
    BATCH = 8
    INPUT_DIMS = 16
    FC1_DIMS = 64
    FC2_DIMS = 32
    N_ACTIONS = 4

    key = jax.random.PRNGKey(0)
    k_state, k_params = jax.random.split(key, 2)

    state = jax.random.normal(k_state, (BATCH, INPUT_DIMS), jnp.float32)
    params = init_params(k_params, INPUT_DIMS, FC1_DIMS, FC2_DIMS, N_ACTIONS)

    out = actor_forward(state, params)
    out = jax.block_until_ready(out)

    ref = reference_forward(state, params)
    assert out.shape == (BATCH, N_ACTIONS), out.shape
    assert bool(jnp.all(jnp.abs(out) <= 1.0)), "tanh output out of range"
    assert jnp.allclose(out, ref, atol=1e-4, rtol=1e-4), (out, ref)

    print("KERNEL_OK")
</pallas_src>

<mosaic_0001>
module attributes {stable_mosaic.version = 11 : i64} {
  func.func @actor_kernel(%arg0: i32, %arg1: memref<8x16xf32, #tpu.memory_space<vmem>>, %arg2: memref<16x64xf32, #tpu.memory_space<vmem>>, %arg3: memref<64x32xf32, #tpu.memory_space<vmem>>, %arg4: memref<32x4xf32, #tpu.memory_space<vmem>>, %arg5: memref<8x64xf32, #tpu.memory_space<vmem>>, %arg6: memref<8x4xf32, #tpu.memory_space<vmem>>) attributes {dimension_semantics = [#tpu.dimension_semantics<parallel>], iteration_bounds = array<i64: 1>, scalar_prefetch = 0 : i64, scratch_operands = 0 : i64, tpu.core_type = #tpu.core_type<tc>, window_params = [{transform_indices = @transform_0, window_bounds = array<i64: 8, 16>}, {pipeline_mode = #tpu.pipeline_mode<synchronous>, transform_indices = @transform_1, window_bounds = array<i64: 16, 64>}, {pipeline_mode = #tpu.pipeline_mode<synchronous>, transform_indices = @transform_2, window_bounds = array<i64: 64, 32>}, {pipeline_mode = #tpu.pipeline_mode<synchronous>, transform_indices = @transform_3, window_bounds = array<i64: 32, 4>}, {pipeline_mode = #tpu.pipeline_mode<synchronous>, transform_indices = @transform_4, window_bounds = array<i64: 8, 64>}, {transform_indices = @transform_5, window_bounds = array<i64: 8, 4>}]} {
    %c0 = arith.constant 0 : index
    %c0_0 = arith.constant 0 : index
    %0 = vector.load %arg1[%c0, %c0_0] : memref<8x16xf32, #tpu.memory_space<vmem>>, vector<8x16xf32>
    %c0_1 = arith.constant 0 : index
    %c0_2 = arith.constant 0 : index
    %1 = vector.load %arg5[%c0_1, %c0_2] : memref<8x64xf32, #tpu.memory_space<vmem>>, vector<8x64xf32>
    %2 = vector.extract_strided_slice %1 {offsets = [0, 0], sizes = [1, 64], strides = [1, 1]} : vector<8x64xf32> to vector<1x64xf32>
    %3 = vector.extract_strided_slice %1 {offsets = [1, 0], sizes = [1, 64], strides = [1, 1]} : vector<8x64xf32> to vector<1x64xf32>
    %4 = vector.extract_strided_slice %1 {offsets = [2, 0], sizes = [1, 64], strides = [1, 1]} : vector<8x64xf32> to vector<1x64xf32>
    %5 = vector.extract_strided_slice %1 {offsets = [3, 0], sizes = [1, 32], strides = [1, 1]} : vector<8x64xf32> to vector<1x32xf32>
    %6 = vector.extract_strided_slice %1 {offsets = [4, 0], sizes = [1, 32], strides = [1, 1]} : vector<8x64xf32> to vector<1x32xf32>
    %7 = vector.extract_strided_slice %1 {offsets = [5, 0], sizes = [1, 32], strides = [1, 1]} : vector<8x64xf32> to vector<1x32xf32>
    %8 = vector.extract_strided_slice %1 {offsets = [6, 0], sizes = [1, 4], strides = [1, 1]} : vector<8x64xf32> to vector<1x4xf32>
    %c0_3 = arith.constant 0 : index
    %c0_4 = arith.constant 0 : index
    %9 = vector.load %arg2[%c0_3, %c0_4] : memref<16x64xf32, #tpu.memory_space<vmem>>, vector<16x64xf32>
    %cst = arith.constant dense<0.000000e+00> : vector<8x64xf32>
    %10 = tpu.matmul %0, %9, %cst {dimension_numbers = #tpu.dot_dimension_numbers<[1], [0], [0], [1], [0, 0, 1, 1], [], []>} : vector<8x16xf32>, vector<16x64xf32>, vector<8x64xf32> -> vector<8x64xf32>
    %11 = vector.broadcast %2 : vector<1x64xf32> to vector<8x64xf32>
    %12 = arith.addf %10, %11 : vector<8x64xf32>
    %cst_5 = arith.constant dense<0.000000e+00> : vector<8xf32>
    %13 = vector.multi_reduction <add>, %12, %cst_5 [1] : vector<8x64xf32> to vector<8xf32>
    %14 = vector.shape_cast %13 : vector<8xf32> to vector<8x1xf32>
    %15 = arith.mulf %12, %12 : vector<8x64xf32>
    %cst_6 = arith.constant dense<0.000000e+00> : vector<8xf32>
    %16 = vector.multi_reduction <add>, %15, %cst_6 [1] : vector<8x64xf32> to vector<8xf32>
    %17 = vector.shape_cast %16 : vector<8xf32> to vector<8x1xf32>
    %cst_7 = arith.constant 1.562500e-02 : f32
    %18 = vector.broadcast %cst_7 : f32 to vector<8x1xf32>
    %19 = arith.mulf %14, %18 : vector<8x1xf32>
    %cst_8 = arith.constant 1.562500e-02 : f32
    %20 = vector.broadcast %cst_8 : f32 to vector<8x1xf32>
    %21 = arith.mulf %17, %20 : vector<8x1xf32>
    %22 = arith.mulf %19, %19 : vector<8x1xf32>
    %23 = arith.subf %21, %22 : vector<8x1xf32>
    %24 = vector.broadcast %19 : vector<8x1xf32> to vector<8x64xf32>
    %25 = arith.subf %12, %24 : vector<8x64xf32>
    %cst_9 = arith.constant 9.99999974E-6 : f32
    %26 = vector.broadcast %cst_9 : f32 to vector<8x1xf32>
    %27 = arith.addf %23, %26 : vector<8x1xf32>
    %28 = math.rsqrt %27 : vector<8x1xf32>
    %29 = vector.broadcast %28 : vector<8x1xf32> to vector<8x64xf32>
    %30 = arith.mulf %25, %29 : vector<8x64xf32>
    %31 = vector.broadcast %3 : vector<1x64xf32> to vector<8x64xf32>
    %32 = arith.mulf %30, %31 : vector<8x64xf32>
    %33 = vector.broadcast %4 : vector<1x64xf32> to vector<8x64xf32>
    %34 = arith.addf %32, %33 : vector<8x64xf32>
    %cst_10 = arith.constant 0.000000e+00 : f32
    %35 = vector.broadcast %cst_10 : f32 to vector<8x64xf32>
    %36 = arith.maximumf %34, %35 : vector<8x64xf32>
    %c0_11 = arith.constant 0 : index
    %c0_12 = arith.constant 0 : index
    %37 = vector.load %arg3[%c0_11, %c0_12] : memref<64x32xf32, #tpu.memory_space<vmem>>, vector<64x32xf32>
    %cst_13 = arith.constant dense<0.000000e+00> : vector<8x32xf32>
    %38 = tpu.matmul %36, %37, %cst_13 {dimension_numbers = #tpu.dot_dimension_numbers<[1], [0], [0], [1], [0, 0, 1, 1], [], []>} : vector<8x64xf32>, vector<64x32xf32>, vector<8x32xf32> -> vector<8x32xf32>
    %39 = vector.broadcast %5 : vector<1x32xf32> to vector<8x32xf32>
    %40 = arith.addf %38, %39 : vector<8x32xf32>
    %cst_14 = arith.constant dense<0.000000e+00> : vector<8xf32>
    %41 = vector.multi_reduction <add>, %40, %cst_14 [1] : vector<8x32xf32> to vector<8xf32>
    %42 = vector.shape_cast %41 : vector<8xf32> to vector<8x1xf32>
    %43 = arith.mulf %40, %40 : vector<8x32xf32>
    %cst_15 = arith.constant dense<0.000000e+00> : vector<8xf32>
    %44 = vector.multi_reduction <add>, %43, %cst_15 [1] : vector<8x32xf32> to vector<8xf32>
    %45 = vector.shape_cast %44 : vector<8xf32> to vector<8x1xf32>
    %cst_16 = arith.constant 3.125000e-02 : f32
    %46 = vector.broadcast %cst_16 : f32 to vector<8x1xf32>
    %47 = arith.mulf %42, %46 : vector<8x1xf32>
    %cst_17 = arith.constant 3.125000e-02 : f32
    %48 = vector.broadcast %cst_17 : f32 to vector<8x1xf32>
    %49 = arith.mulf %45, %48 : vector<8x1xf32>
    %50 = arith.mulf %47, %47 : vector<8x1xf32>
    %51 = arith.subf %49, %50 : vector<8x1xf32>
    %52 = vector.broadcast %47 : vector<8x1xf32> to vector<8x32xf32>
    %53 = arith.subf %40, %52 : vector<8x32xf32>
    %cst_18 = arith.constant 9.99999974E-6 : f32
    %54 = vector.broadcast %cst_18 : f32 to vector<8x1xf32>
    %55 = arith.addf %51, %54 : vector<8x1xf32>
    %56 = math.rsqrt %55 : vector<8x1xf32>
    %57 = vector.broadcast %56 : vector<8x1xf32> to vector<8x32xf32>
    %58 = arith.mulf %53, %57 : vector<8x32xf32>
    %59 = vector.broadcast %6 : vector<1x32xf32> to vector<8x32xf32>
    %60 = arith.mulf %58, %59 : vector<8x32xf32>
    %61 = vector.broadcast %7 : vector<1x32xf32> to vector<8x32xf32>
    %62 = arith.addf %60, %61 : vector<8x32xf32>
    %cst_19 = arith.constant 0.000000e+00 : f32
    %63 = vector.broadcast %cst_19 : f32 to vector<8x32xf32>
    %64 = arith.maximumf %62, %63 : vector<8x32xf32>
    %c0_20 = arith.constant 0 : index
    %c0_21 = arith.constant 0 : index
    %65 = vector.load %arg4[%c0_20, %c0_21] : memref<32x4xf32, #tpu.memory_space<vmem>>, vector<32x4xf32>
    %cst_22 = arith.constant dense<0.000000e+00> : vector<8x4xf32>
    %66 = tpu.matmul %64, %65, %cst_22 {dimension_numbers = #tpu.dot_dimension_numbers<[1], [0], [0], [1], [0, 0, 1, 1], [], []>} : vector<8x32xf32>, vector<32x4xf32>, vector<8x4xf32> -> vector<8x4xf32>
    %67 = vector.broadcast %8 : vector<1x4xf32> to vector<8x4xf32>
    %68 = arith.addf %66, %67 : vector<8x4xf32>
    %69 = math.tanh %68 : vector<8x4xf32>
    %c0_23 = arith.constant 0 : index
    %c0_24 = arith.constant 0 : index
    %70 = vector.load %arg6[%c0_23, %c0_24] : memref<8x4xf32, #tpu.memory_space<vmem>>, vector<8x4xf32>
    tpu.vector_store %arg6[%c0_23, %c0_24], %69 {strides = array<i32>} : memref<8x4xf32, #tpu.memory_space<vmem>>, vector<8x4xf32>,
    return
  }
  func.func @transform_0(%arg0: i32) -> (i32, i32) {
    %c0_i32 = arith.constant 0 : i32
    %c0_i32_0 = arith.constant 0 : i32
    return %arg0, %c0_i32 : i32, i32
  }
  func.func @transform_1(%arg0: i32) -> (i32, i32) {
    %c0_i32 = arith.constant 0 : i32
    %c0_i32_0 = arith.constant 0 : i32
    %c0_i32_1 = arith.constant 0 : i32
    return %c0_i32, %c0_i32_0 : i32, i32
  }
  func.func @transform_2(%arg0: i32) -> (i32, i32) {
    %c0_i32 = arith.constant 0 : i32
    %c0_i32_0 = arith.constant 0 : i32
    %c0_i32_1 = arith.constant 0 : i32
    return %c0_i32, %c0_i32_0 : i32, i32
  }
  func.func @transform_3(%arg0: i32) -> (i32, i32) {
    %c0_i32 = arith.constant 0 : i32
    %c0_i32_0 = arith.constant 0 : i32
    %c0_i32_1 = arith.constant 0 : i32
    return %c0_i32, %c0_i32_0 : i32, i32
  }
  func.func @transform_4(%arg0: i32) -> (i32, i32) {
    %c0_i32 = arith.constant 0 : i32
    %c0_i32_0 = arith.constant 0 : i32
    %c0_i32_1 = arith.constant 0 : i32
    return %c0_i32, %c0_i32_0 : i32, i32
  }
  func.func @transform_5(%arg0: i32) -> (i32, i32) {
    %c0_i32 = arith.constant 0 : i32
    %c0_i32_0 = arith.constant 0 : i32
    return %arg0, %c0_i32 : i32, i32
  }
}

</mosaic_0001>

<bundles_post_ra>
// kernel: tpu_custom_call.1
= control target key start
LH: loop header
LB: loop body
LE: loop exit
PB: predicated region body
PF: predicated region fallthrough
CT: control target
= control target key end

     0   :  { %vm25_vm0 = vcmask 130048   ;;  %vm49_vm1 = vcmask 523264   ;;  %vm111_vm5 = vcmask 261120   ;;  %vm170_vm9 = vcmask 31744   ;;  %s281_s1 = inlined_call_operand.vmem [shape: f32[16,64], index: 1, kind: input, shape index: {}]   ;;  %s282_s0 = inlined_call_operand.vmem [shape: f32[8,16], index: 0, kind: input, shape index: {}]   ;;  %s283_s4 = inlined_call_operand.vmem [shape: f32[8,64], index: 4, kind: input, shape index: {}]   ;;  %s284_s2 = inlined_call_operand.vmem [shape: f32[64,32], index: 2, kind: input, shape index: {}]   ;;  %s285_s3 = inlined_call_operand.vmem [shape: f32[32,4], index: 3, kind: input, shape index: {}]   ;;  %s286_s5 = inlined_call_operand.vmem [shape: f32[8,4], index: 5, kind: output, shape index: {}]  }
   0x1   :  { %v23_v0 = vld [vmem:[%s281_s1 + $0x8] sm:$0xff]  ;;  %v22_v1 = vld [vmem:[%s281_s1] sm:$0xff]  ;;  %v86_v10 = vld [vmem:[%s284_s2 + $0x38] sm:$0xff] }
   0x2   :  { %43 = vmatpush.msra.mxu0 %v23_v0  ;;  %v20_v2 = vld [vmem:[%s282_s0] sm:$0xff]  ;;  %99 = vmatpush.msra.mxu1 %v86_v10  ;;  %v85_v11 = vld [vmem:[%s284_s2 + $0x30] sm:$0xff]  ;;  %v84_v12 = vld [vmem:[%s284_s2 + $0x28] sm:$0xff] }
   0x3   :  { %v227_v3 = vld [vmem:[%s283_s4] sm:$0xff]  ;;  %v82_v14 = vld [vmem:[%s284_s2 + $0x18] sm:$0xff]  ;;  %v81_v16 = vld [vmem:[%s284_s2 + $0x10] sm:$0xff] }
   0x4   :  { %44 = vmatpush.msra.mxu0 %v22_v1  ;;  %v24_v4 = vperm.slane %v227_v3, 0  ;;  %100 = vmatpush.msra.mxu1 %v85_v11  ;;  %v83_v13 = vld [vmem:[%s284_s2 + $0x20] sm:$0xff]  ;;  %v80_v17 = vld [vmem:[%s284_s2 + $0x8] sm:$0xff]  ;;  %v74_v32 = vperm.slane %v227_v3, 1  ;;  %v76_v35 = vperm.slane %v227_v3, 2  ;;  %v87_v39 = vperm.slane %v227_v3, 3 }
   0x5   :  { %176 = vmatmul.msk.f32.vlgmr.msra.gmra.mxu0 %vm25_vm0, %v20_v2  ;;  %v79_v19 = vld [vmem:[%s284_s2] sm:$0xff]  ;;  %v144_v45 = vld [vmem:[%s285_s3 + $0x18] sm:$0xff]  ;;  %v143_v46 = vld [vmem:[%s285_s3 + $0x10] sm:$0xff]  ;;  %v136_v63 = vperm.slane %v227_v3, 4  ;;  %v138_v2 = vperm.slane %v227_v3, 5 }
   0x6   :  { %101 = vmatpush.msra.mxu1 %v84_v12  ;;  %161 = vmatpush.msra.mxu2 %v144_v45  ;;  %v142_v48 = vld [vmem:[%s285_s3 + $0x8] sm:$0xff]  ;;  %v141_v49 = vld [vmem:[%s285_s3] sm:$0xff] }
   0x8   :  { %102 = vmatpush.msra.mxu1 %v83_v13  ;;  %162 = vmatpush.msra.mxu2 %v143_v46 }
   0xa   :  { %103 = vmatpush.msra.mxu1 %v82_v14  ;;  %163 = vmatpush.msra.mxu2 %v142_v48 }
   0xc   :  { %104 = vmatpush.msra.mxu1 %v81_v16  ;;  %164 = vmatpush.msra.mxu2 %v141_v49 }
   0xe   :  { %105 = vmatpush.msra.mxu1 %v80_v17 }
  0x10   :  { %106 = vmatpush.msra.mxu1 %v79_v19 }
  0x82   :  { %v46_v5 = vpop.f32.mrf.mxu0 }
  0x83   :  { %v47_v6 = vadd.f32 %v46_v5, %v24_v4 }
  0x85   :  { %v50_v7 = vsel %vm49_vm1, %v47_v6, 0.0  ;;  %v53_v8 = vmul.f32 %v47_v6, %v47_v6 }
  0x86   :  { %51 = vadd.xlane.f32.xlu0 %v50_v7  ;;  %v145_v7 = vperm.slane %v227_v3, 6 }
  0x87   :  { %v54_v9 = vsel %vm49_vm1, %v53_v8, 0.0 }
  0x8e   :  { %55 = vadd.xlane.f32.xlu0 %v54_v9 }
  0xf9   :  { %v52_v15 = vpop.xlane.xlu0 %51 }
  0xfa   :  { %v57_v18 = vmul.f32 0.015625, %v52_v15 }
  0xfc   :  { %v59_v21 = vmul.f32 %v57_v18, %v57_v18  ;;  %v61_v31 = vsub.f32 %v47_v6, %v57_v18 }
 0x101   :  { %v56_v20 = vpop.xlane.xlu0 %55 }
 0x102   :  { %v58_v22 = vmul.f32 0.015625, %v56_v20 }
 0x104   :  { %v60_v23 = vsub.f32 %v58_v22, %v59_v21 }
 0x106   :  { %v62_v24 = vadd.f32 1e-05, %v60_v23 }
 0x108   :  { %179 = vrsqrt.f32 %v62_v24  ;;  %vm69_vm3 = vweird.f32 %v62_v24 }
 0x10e   :  { %v180_v25 = vpop.eup %179 }
 0x10f   :  { %v64_v26 = vmul.f32 %v180_v25, %v62_v24  ;;  %vm70_vm2 = vweird.f32 %v180_v25 }
 0x110   :  { %vm71_vm4 = vmor %vm69_vm3, %vm70_vm2 }
 0x111   :  { %v65_v27 = vmul.f32 %v180_v25, %v64_v26 }
 0x113   :  { %v66_v28 = vmul.f32 0.5, %v65_v27 }
 0x115   :  { %v67_v29 = vsub.f32 1.5, %v66_v28 }
 0x117   :  { %v68_v30 = vmul.f32 %v180_v25, %v67_v29 }
 0x119   :  { %v72_v33 = vsel %vm71_vm4, %v180_v25, %v68_v30 }
 0x11a   :  { %v73_v34 = vmul.f32 %v72_v33, %v61_v31 }
 0x11c   :  { %v75_v36 = vmul.f32 %v74_v32, %v73_v34 }
 0x11e   :  { %v77_v37 = vadd.f32 %v76_v35, %v75_v36 }
 0x120   :  { %v78_v38 = vmax.f32 %v77_v37, 0.0 }
 0x122   :  { %177 = vmatmul.msk.f32.vlgmr.msra.gmra.mxu1 %vm49_vm1, %v78_v38 }
 0x19f   :  { %v108_v40 = vpop.f32.mrf.mxu1 }
 0x1a0   :  { %v109_v41 = vadd.f32 %v108_v40, %v87_v39 }
 0x1a2   :  { %v112_v42 = vsel %vm111_vm5, %v109_v41, 0.0  ;;  %v115_v43 = vmul.f32 %v109_v41, %v109_v41 }
 0x1a3   :  { %113 = vadd.xlane.f32.xlu1 %v112_v42 }
 0x1a4   :  { %v116_v44 = vsel %vm111_vm5, %v115_v43, 0.0 }
 0x1ab   :  { %117 = vadd.xlane.f32.xlu1 %v116_v44 }
 0x216   :  { %v114_v47 = vpop.xlane.xlu1 %113 }
 0x217   :  { %v119_v50 = vmul.f32 0.03125, %v114_v47 }
 0x219   :  { %v121_v52 = vmul.f32 %v119_v50, %v119_v50  ;;  %v123_v62 = vsub.f32 %v109_v41, %v119_v50 }
 0x21e   :  { %v118_v51 = vpop.xlane.xlu1 %117 }
 0x21f   :  { %v120_v53 = vmul.f32 0.03125, %v118_v51 }
 0x221   :  { %v122_v54 = vsub.f32 %v120_v53, %v121_v52 }
 0x223   :  { %v124_v55 = vadd.f32 1e-05, %v122_v54 }
 0x225   :  { %181 = vrsqrt.f32 %v124_v55  ;;  %vm131_vm7 = vweird.f32 %v124_v55 }
 0x22b   :  { %v182_v56 = vpop.eup %181 }
 0x22c   :  { %v126_v57 = vmul.f32 %v182_v56, %v124_v55  ;;  %vm132_vm6 = vweird.f32 %v182_v56 }
 0x22d   :  { %vm133_vm8 = vmor %vm131_vm7, %vm132_vm6 }
 0x22e   :  { %v127_v58 = vmul.f32 %v182_v56, %v126_v57 }
 0x230   :  { %v128_v59 = vmul.f32 0.5, %v127_v58 }
 0x232   :  { %v129_v60 = vsub.f32 1.5, %v128_v59 }
 0x234   :  { %v130_v61 = vmul.f32 %v182_v56, %v129_v60 }
 0x236   :  { %v134_v0 = vsel %vm133_vm8, %v182_v56, %v130_v61 }
 0x237   :  { %v135_v1 = vmul.f32 %v134_v0, %v123_v62 }
 0x239   :  { %v137_v4 = vmul.f32 %v136_v63, %v135_v1 }
 0x23b   :  { %v139_v5 = vadd.f32 %v138_v2, %v137_v4 }
 0x23d   :  { %v140_v6 = vmax.f32 %v139_v5, 0.0 }
 0x23f   :  { %178 = vmatmul.msk.f32.vlgmr.msra.gmra.mxu2 %vm111_vm5, %v140_v6 }
 0x2c2   :  { %v166_v8 = vpop.f32.mrf.mxu2 }
 0x2c3   :  { %v167_v9 = vadd.f32 %v166_v8, %v145_v7 }
 0x2c5   :  { %183 = vtanh.f32 %v167_v9 }
 0x2cb   :  { %v184_v10 = vpop.eup %183 }
 0x2cc   :  { %171 = vst.msk [vmem:[%s286_s5] sm:$0xff] %vm170_vm9, %v184_v10 }

</bundles_post_ra>
